<compile_context>
chip_gen: v7x
topology: tpu7x:2x2x1
jax: 0.10.0
libtpu: 0.0.40
codegen_flags: <defaults>
</compile_context>

<pallas_src>
import numpy as np
import jax
import jax.numpy as jnp
from jax import lax
from jax.experimental import pallas as pl
from jax.experimental.pallas import tpu as pltpu


def _make_dense_kernel(Cin, Cout, H, W, K):
    L = H * W
    pad = (K - 1) // 2
    P = pad * W + pad  # zero padding on each side of the flattened spatial axis

    def kernel(xp_ref, w_ref, o_ref):
        # xp_ref: (1, Cin, L + 2P)   flattened spatial, zero padded
        # w_ref : (Cout, K*K*Cin)    tap-major / channel-minor reordered conv weight
        # o_ref : (1, Cin + Cout, L)
        x_center = xp_ref[0, :, P:P + L]                       # (Cin, L) == original x

        # column (w) coordinate of each flattened position, for masking horizontal taps
        col = lax.broadcasted_iota(jnp.int32, (1, L), 1) % W

        taps = []
        for dy in range(-pad, pad + 1):
            for dx in range(-pad, pad + 1):
                off = P + dy * W + dx                          # static, >= 0
                sl = xp_ref[0, :, off:off + L]                 # (Cin, L) static lane slice
                if dx != 0:
                    valid = (col + dx >= 0) & (col + dx < W)   # stay inside the image row
                    sl = jnp.where(valid, sl, 0)
                taps.append(sl)
        patches = jnp.concatenate(taps, axis=0)                # (K*K*Cin, L)

        acc = jnp.dot(w_ref[...], patches,
                      preferred_element_type=jnp.float32)      # (Cout, L) on the MXU
        conv_relu = jnp.maximum(acc, 0.0).astype(o_ref.dtype)

        # torch.cat((x, relu(conv(x))), dim=1) -> single lane-dense store
        o_ref[0, :, :] = jnp.concatenate([x_center, conv_relu], axis=0)

    return kernel


def make_dense_forward(x, weight):
    """Equivalent of make_dense(nChannels, growthRate).forward(x).

    x: (N, Cin, H, W); weight: (Cout, Cin, K, K) with K odd (bias-free, 'same' padding).
    Returns (N, Cin + Cout, H, W).
    """
    N, Cin, H, W = x.shape
    Cout, Cin_w, KH, KW = weight.shape
    assert Cin == Cin_w, "weight channel mismatch"
    assert KH == KW and KH % 2 == 1, "odd square kernel expected"
    K = KH
    pad = (K - 1) // 2
    L = H * W
    P = pad * W + pad

    # Flatten spatial and zero-pad so every KxK tap is a static lane-slice in-kernel.
    xf = x.reshape(N, Cin, L)
    xp = jnp.pad(xf, ((0, 0), (0, 0), (P, P)))                 # (N, Cin, L + 2P)

    # Reorder weight so patch rows (tap-major, channel-minor) line up with it:
    #   w2d[o, t*Cin + c] = weight[o, c, ky, kx],  t = ky*K + kx
    w2d = jnp.transpose(weight, (0, 2, 3, 1)).reshape(Cout, K * K * Cin)

    out_flat = pl.pallas_call(
        _make_dense_kernel(Cin, Cout, H, W, K),
        out_shape=jax.ShapeDtypeStruct((N, Cin + Cout, L), x.dtype),
        grid=(N,),
        in_specs=[
            pl.BlockSpec((1, Cin, L + 2 * P), lambda n: (n, 0, 0)),
            pl.BlockSpec((Cout, K * K * Cin), lambda n: (0, 0)),
        ],
        out_specs=pl.BlockSpec((1, Cin + Cout, L), lambda n: (n, 0, 0)),
        compiler_params=pltpu.CompilerParams(dimension_semantics=("parallel",)),
    )(xp, w2d)
    return out_flat.reshape(N, Cin + Cout, H, W)


def make_dense_ref(x, weight):
    """Pure-JAX reference matching the PyTorch module."""
    conv = lax.conv_general_dilated(
        x, weight, window_strides=(1, 1), padding="SAME",
        dimension_numbers=("NCHW", "OIHW", "NCHW"),
        precision=lax.Precision.HIGHEST)
    return jnp.concatenate([x, jax.nn.relu(conv)], axis=1)


if __name__ == "__main__":
    N, nChannels, growthRate, H, W = 2, 4, 8, 16, 16
    key = jax.random.PRNGKey(0)
    kx, kw = jax.random.split(key)
    x = jax.random.normal(kx, (N, nChannels, H, W), dtype=jnp.float32)
    weight = jax.random.normal(kw, (growthRate, nChannels, 3, 3), dtype=jnp.float32) * 0.1

    out = make_dense_forward(x, weight)
    out = jax.block_until_ready(out)

    ref = make_dense_ref(x, weight)
    assert out.shape == (N, nChannels + growthRate, H, W), out.shape
    np.testing.assert_allclose(np.asarray(out), np.asarray(ref), rtol=1e-3, atol=1e-3)

    print("KERNEL_OK")
</pallas_src>

<mosaic_0001>
module attributes {stable_mosaic.version = 11 : i64} {
  func.func @kernel(%arg0: i32, %arg1: memref<1x4x290xf32, #tpu.memory_space<vmem>>, %arg2: memref<8x36xf32, #tpu.memory_space<vmem>>, %arg3: memref<1x12x256xf32, #tpu.memory_space<vmem>>) attributes {dimension_semantics = [#tpu.dimension_semantics<parallel>], iteration_bounds = array<i64: 2>, scalar_prefetch = 0 : i64, scratch_operands = 0 : i64, tpu.core_type = #tpu.core_type<tc>, window_params = [{transform_indices = @transform_0, window_bounds = array<i64: 1, 4, 290>}, {pipeline_mode = #tpu.pipeline_mode<synchronous>, transform_indices = @transform_1, window_bounds = array<i64: 8, 36>}, {transform_indices = @transform_2, window_bounds = array<i64: 1, 12, 256>}]} {
    %c0 = arith.constant 0 : index
    %c0_0 = arith.constant 0 : index
    %c17 = arith.constant 17 : index
    %0 = vector.load %arg1[%c0, %c0_0, %c17] : memref<1x4x290xf32, #tpu.memory_space<vmem>>, vector<1x4x256xf32>
    %1 = vector.shape_cast %0 : vector<1x4x256xf32> to vector<4x256xf32>
    %2 = tpu.iota {dimensions = array<i32: 1>} : vector<1x256xi32>
    %c16_i32 = arith.constant 16 : i32
    %c0_i32 = arith.constant 0 : i32
    %3 = arith.cmpi eq, %c16_i32, %c0_i32 : i32
    %c1_i32 = arith.constant 1 : i32
    %4 = arith.select %3, %c1_i32, %c16_i32 : i32
    %5 = vector.broadcast %4 : i32 to vector<1x256xi32>
    %6 = arith.remsi %2, %5 : vector<1x256xi32>
    %c0_i32_1 = arith.constant 0 : i32
    %7 = vector.broadcast %c0_i32_1 : i32 to vector<1x256xi32>
    %8 = arith.cmpi ne, %6, %7 : vector<1x256xi32>
    %c0_i32_2 = arith.constant 0 : i32
    %9 = vector.broadcast %c0_i32_2 : i32 to vector<1x256xi32>
    %10 = arith.cmpi slt, %6, %9 : vector<1x256xi32>
    %c0_i32_3 = arith.constant 0 : i32
    %11 = arith.cmpi slt, %4, %c0_i32_3 : i32
    %12 = vector.broadcast %11 : i1 to vector<1x256xi1>
    %13 = vector.broadcast %12 : vector<1x256xi1> to vector<1x256xi1>
    %14 = arith.xori %10, %13 : vector<1x256xi1>
    %15 = arith.andi %14, %8 : vector<1x256xi1>
    %16 = vector.broadcast %4 : i32 to vector<1x256xi32>
    %17 = arith.addi %6, %16 : vector<1x256xi32>
    %18 = arith.select %15, %17, %6 : vector<1x256xi1>, vector<1x256xi32>
    %c0_4 = arith.constant 0 : index
    %c0_5 = arith.constant 0 : index
    %c0_6 = arith.constant 0 : index
    %19 = vector.load %arg1[%c0_4, %c0_5, %c0_6] : memref<1x4x290xf32, #tpu.memory_space<vmem>>, vector<1x4x256xf32>
    %20 = vector.shape_cast %19 : vector<1x4x256xf32> to vector<4x256xf32>
    %c-1_i32 = arith.constant -1 : i32
    %21 = vector.broadcast %c-1_i32 : i32 to vector<1x256xi32>
    %22 = arith.addi %18, %21 : vector<1x256xi32>
    %c0_i32_7 = arith.constant 0 : i32
    %23 = vector.broadcast %c0_i32_7 : i32 to vector<1x256xi32>
    %24 = arith.cmpi sge, %22, %23 : vector<1x256xi32>
    %c-1_i32_8 = arith.constant -1 : i32
    %25 = vector.broadcast %c-1_i32_8 : i32 to vector<1x256xi32>
    %26 = arith.addi %18, %25 : vector<1x256xi32>
    %c16_i32_9 = arith.constant 16 : i32
    %27 = vector.broadcast %c16_i32_9 : i32 to vector<1x256xi32>
    %28 = arith.cmpi slt, %26, %27 : vector<1x256xi32>
    %29 = arith.andi %24, %28 : vector<1x256xi1>
    %c0_i32_10 = arith.constant 0 : i32
    %30 = arith.sitofp %c0_i32_10 : i32 to f32
    %31 = vector.shape_cast %29 : vector<1x256xi1> to vector<1x256xi1>
    %32 = vector.broadcast %31 : vector<1x256xi1> to vector<4x256xi1>
    %33 = vector.broadcast %30 : f32 to vector<4x256xf32>
    %34 = arith.select %32, %20, %33 : vector<4x256xi1>, vector<4x256xf32>
    %c0_11 = arith.constant 0 : index
    %c0_12 = arith.constant 0 : index
    %c1 = arith.constant 1 : index
    %35 = vector.load %arg1[%c0_11, %c0_12, %c1] : memref<1x4x290xf32, #tpu.memory_space<vmem>>, vector<1x4x256xf32>
    %36 = vector.shape_cast %35 : vector<1x4x256xf32> to vector<4x256xf32>
    %c0_13 = arith.constant 0 : index
    %c0_14 = arith.constant 0 : index
    %c2 = arith.constant 2 : index
    %37 = vector.load %arg1[%c0_13, %c0_14, %c2] : memref<1x4x290xf32, #tpu.memory_space<vmem>>, vector<1x4x256xf32>
    %38 = vector.shape_cast %37 : vector<1x4x256xf32> to vector<4x256xf32>
    %c1_i32_15 = arith.constant 1 : i32
    %39 = vector.broadcast %c1_i32_15 : i32 to vector<1x256xi32>
    %40 = arith.addi %18, %39 : vector<1x256xi32>
    %c0_i32_16 = arith.constant 0 : i32
    %41 = vector.broadcast %c0_i32_16 : i32 to vector<1x256xi32>
    %42 = arith.cmpi sge, %40, %41 : vector<1x256xi32>
    %c1_i32_17 = arith.constant 1 : i32
    %43 = vector.broadcast %c1_i32_17 : i32 to vector<1x256xi32>
    %44 = arith.addi %18, %43 : vector<1x256xi32>
    %c16_i32_18 = arith.constant 16 : i32
    %45 = vector.broadcast %c16_i32_18 : i32 to vector<1x256xi32>
    %46 = arith.cmpi slt, %44, %45 : vector<1x256xi32>
    %47 = arith.andi %42, %46 : vector<1x256xi1>
    %c0_i32_19 = arith.constant 0 : i32
    %48 = arith.sitofp %c0_i32_19 : i32 to f32
    %49 = vector.shape_cast %47 : vector<1x256xi1> to vector<1x256xi1>
    %50 = vector.broadcast %49 : vector<1x256xi1> to vector<4x256xi1>
    %51 = vector.broadcast %48 : f32 to vector<4x256xf32>
    %52 = arith.select %50, %38, %51 : vector<4x256xi1>, vector<4x256xf32>
    %c0_20 = arith.constant 0 : index
    %c0_21 = arith.constant 0 : index
    %c16 = arith.constant 16 : index
    %53 = vector.load %arg1[%c0_20, %c0_21, %c16] : memref<1x4x290xf32, #tpu.memory_space<vmem>>, vector<1x4x256xf32>
    %54 = vector.shape_cast %53 : vector<1x4x256xf32> to vector<4x256xf32>
    %c-1_i32_22 = arith.constant -1 : i32
    %55 = vector.broadcast %c-1_i32_22 : i32 to vector<1x256xi32>
    %56 = arith.addi %18, %55 : vector<1x256xi32>
    %c0_i32_23 = arith.constant 0 : i32
    %57 = vector.broadcast %c0_i32_23 : i32 to vector<1x256xi32>
    %58 = arith.cmpi sge, %56, %57 : vector<1x256xi32>
    %c-1_i32_24 = arith.constant -1 : i32
    %59 = vector.broadcast %c-1_i32_24 : i32 to vector<1x256xi32>
    %60 = arith.addi %18, %59 : vector<1x256xi32>
    %c16_i32_25 = arith.constant 16 : i32
    %61 = vector.broadcast %c16_i32_25 : i32 to vector<1x256xi32>
    %62 = arith.cmpi slt, %60, %61 : vector<1x256xi32>
    %63 = arith.andi %58, %62 : vector<1x256xi1>
    %c0_i32_26 = arith.constant 0 : i32
    %64 = arith.sitofp %c0_i32_26 : i32 to f32
    %65 = vector.shape_cast %63 : vector<1x256xi1> to vector<1x256xi1>
    %66 = vector.broadcast %65 : vector<1x256xi1> to vector<4x256xi1>
    %67 = vector.broadcast %64 : f32 to vector<4x256xf32>
    %68 = arith.select %66, %54, %67 : vector<4x256xi1>, vector<4x256xf32>
    %c0_27 = arith.constant 0 : index
    %c0_28 = arith.constant 0 : index
    %c17_29 = arith.constant 17 : index
    %69 = vector.load %arg1[%c0_27, %c0_28, %c17_29] : memref<1x4x290xf32, #tpu.memory_space<vmem>>, vector<1x4x256xf32>
    %70 = vector.shape_cast %69 : vector<1x4x256xf32> to vector<4x256xf32>
    %c0_30 = arith.constant 0 : index
    %c0_31 = arith.constant 0 : index
    %c18 = arith.constant 18 : index
    %71 = vector.load %arg1[%c0_30, %c0_31, %c18] : memref<1x4x290xf32, #tpu.memory_space<vmem>>, vector<1x4x256xf32>
    %72 = vector.shape_cast %71 : vector<1x4x256xf32> to vector<4x256xf32>
    %c1_i32_32 = arith.constant 1 : i32
    %73 = vector.broadcast %c1_i32_32 : i32 to vector<1x256xi32>
    %74 = arith.addi %18, %73 : vector<1x256xi32>
    %c0_i32_33 = arith.constant 0 : i32
    %75 = vector.broadcast %c0_i32_33 : i32 to vector<1x256xi32>
    %76 = arith.cmpi sge, %74, %75 : vector<1x256xi32>
    %c1_i32_34 = arith.constant 1 : i32
    %77 = vector.broadcast %c1_i32_34 : i32 to vector<1x256xi32>
    %78 = arith.addi %18, %77 : vector<1x256xi32>
    %c16_i32_35 = arith.constant 16 : i32
    %79 = vector.broadcast %c16_i32_35 : i32 to vector<1x256xi32>
    %80 = arith.cmpi slt, %78, %79 : vector<1x256xi32>
    %81 = arith.andi %76, %80 : vector<1x256xi1>
    %c0_i32_36 = arith.constant 0 : i32
    %82 = arith.sitofp %c0_i32_36 : i32 to f32
    %83 = vector.shape_cast %81 : vector<1x256xi1> to vector<1x256xi1>
    %84 = vector.broadcast %83 : vector<1x256xi1> to vector<4x256xi1>
    %85 = vector.broadcast %82 : f32 to vector<4x256xf32>
    %86 = arith.select %84, %72, %85 : vector<4x256xi1>, vector<4x256xf32>
    %c0_37 = arith.constant 0 : index
    %c0_38 = arith.constant 0 : index
    %c32 = arith.constant 32 : index
    %87 = vector.load %arg1[%c0_37, %c0_38, %c32] : memref<1x4x290xf32, #tpu.memory_space<vmem>>, vector<1x4x256xf32>
    %88 = vector.shape_cast %87 : vector<1x4x256xf32> to vector<4x256xf32>
    %c-1_i32_39 = arith.constant -1 : i32
    %89 = vector.broadcast %c-1_i32_39 : i32 to vector<1x256xi32>
    %90 = arith.addi %18, %89 : vector<1x256xi32>
    %c0_i32_40 = arith.constant 0 : i32
    %91 = vector.broadcast %c0_i32_40 : i32 to vector<1x256xi32>
    %92 = arith.cmpi sge, %90, %91 : vector<1x256xi32>
    %c-1_i32_41 = arith.constant -1 : i32
    %93 = vector.broadcast %c-1_i32_41 : i32 to vector<1x256xi32>
    %94 = arith.addi %18, %93 : vector<1x256xi32>
    %c16_i32_42 = arith.constant 16 : i32
    %95 = vector.broadcast %c16_i32_42 : i32 to vector<1x256xi32>
    %96 = arith.cmpi slt, %94, %95 : vector<1x256xi32>
    %97 = arith.andi %92, %96 : vector<1x256xi1>
    %c0_i32_43 = arith.constant 0 : i32
    %98 = arith.sitofp %c0_i32_43 : i32 to f32
    %99 = vector.shape_cast %97 : vector<1x256xi1> to vector<1x256xi1>
    %100 = vector.broadcast %99 : vector<1x256xi1> to vector<4x256xi1>
    %101 = vector.broadcast %98 : f32 to vector<4x256xf32>
    %102 = arith.select %100, %88, %101 : vector<4x256xi1>, vector<4x256xf32>
    %c0_44 = arith.constant 0 : index
    %c0_45 = arith.constant 0 : index
    %c33 = arith.constant 33 : index
    %103 = vector.load %arg1[%c0_44, %c0_45, %c33] : memref<1x4x290xf32, #tpu.memory_space<vmem>>, vector<1x4x256xf32>
    %104 = vector.shape_cast %103 : vector<1x4x256xf32> to vector<4x256xf32>
    %c0_46 = arith.constant 0 : index
    %c0_47 = arith.constant 0 : index
    %c34 = arith.constant 34 : index
    %105 = vector.load %arg1[%c0_46, %c0_47, %c34] : memref<1x4x290xf32, #tpu.memory_space<vmem>>, vector<1x4x256xf32>
    %106 = vector.shape_cast %105 : vector<1x4x256xf32> to vector<4x256xf32>
    %c1_i32_48 = arith.constant 1 : i32
    %107 = vector.broadcast %c1_i32_48 : i32 to vector<1x256xi32>
    %108 = arith.addi %18, %107 : vector<1x256xi32>
    %c0_i32_49 = arith.constant 0 : i32
    %109 = vector.broadcast %c0_i32_49 : i32 to vector<1x256xi32>
    %110 = arith.cmpi sge, %108, %109 : vector<1x256xi32>
    %c1_i32_50 = arith.constant 1 : i32
    %111 = vector.broadcast %c1_i32_50 : i32 to vector<1x256xi32>
    %112 = arith.addi %18, %111 : vector<1x256xi32>
    %c16_i32_51 = arith.constant 16 : i32
    %113 = vector.broadcast %c16_i32_51 : i32 to vector<1x256xi32>
    %114 = arith.cmpi slt, %112, %113 : vector<1x256xi32>
    %115 = arith.andi %110, %114 : vector<1x256xi1>
    %c0_i32_52 = arith.constant 0 : i32
    %116 = arith.sitofp %c0_i32_52 : i32 to f32
    %117 = vector.shape_cast %115 : vector<1x256xi1> to vector<1x256xi1>
    %118 = vector.broadcast %117 : vector<1x256xi1> to vector<4x256xi1>
    %119 = vector.broadcast %116 : f32 to vector<4x256xf32>
    %120 = arith.select %118, %106, %119 : vector<4x256xi1>, vector<4x256xf32>
    %121 = tpu.concatenate %34, %36, %52, %68, %70, %86, %102, %104, %120 in 0 : vector<4x256xf32>, vector<4x256xf32>, vector<4x256xf32>, vector<4x256xf32>, vector<4x256xf32>, vector<4x256xf32>, vector<4x256xf32>, vector<4x256xf32>, vector<4x256xf32> -> vector<36x256xf32>
    %c0_53 = arith.constant 0 : index
    %c0_54 = arith.constant 0 : index
    %122 = vector.load %arg2[%c0_53, %c0_54] : memref<8x36xf32, #tpu.memory_space<vmem>>, vector<8x36xf32>
    %cst = arith.constant dense<0.000000e+00> : vector<8x256xf32>
    %123 = tpu.matmul %122, %121, %cst {dimension_numbers = #tpu.dot_dimension_numbers<[1], [0], [0], [1], [0, 0, 1, 1], [], []>} : vector<8x36xf32>, vector<36x256xf32>, vector<8x256xf32> -> vector<8x256xf32>
    %cst_55 = arith.constant 0.000000e+00 : f32
    %124 = vector.broadcast %cst_55 : f32 to vector<8x256xf32>
    %125 = arith.maximumf %123, %124 : vector<8x256xf32>
    %126 = tpu.concatenate %1, %125 in 0 : vector<4x256xf32>, vector<8x256xf32> -> vector<12x256xf32>
    %c0_56 = arith.constant 0 : index
    %c0_57 = arith.constant 0 : index
    %c0_58 = arith.constant 0 : index
    %127 = vector.load %arg3[%c0_56, %c0_57, %c0_58] : memref<1x12x256xf32, #tpu.memory_space<vmem>>, vector<1x12x256xf32>
    %128 = vector.shape_cast %127 : vector<1x12x256xf32> to vector<12x256xf32>
    %129 = vector.shape_cast %126 : vector<12x256xf32> to vector<1x12x256xf32>
    tpu.vector_store %arg3[%c0_56, %c0_57, %c0_58], %129 {strides = array<i32>} : memref<1x12x256xf32, #tpu.memory_space<vmem>>, vector<1x12x256xf32>,
    return
  }
  func.func @transform_0(%arg0: i32) -> (i32, i32, i32) {
    %c0_i32 = arith.constant 0 : i32
    %c0_i32_0 = arith.constant 0 : i32
    %c0_i32_1 = arith.constant 0 : i32
    return %arg0, %c0_i32, %c0_i32_0 : i32, i32, i32
  }
  func.func @transform_1(%arg0: i32) -> (i32, i32) {
    %c0_i32 = arith.constant 0 : i32
    %c0_i32_0 = arith.constant 0 : i32
    %c0_i32_1 = arith.constant 0 : i32
    return %c0_i32, %c0_i32_0 : i32, i32
  }
  func.func @transform_2(%arg0: i32) -> (i32, i32, i32) {
    %c0_i32 = arith.constant 0 : i32
    %c0_i32_0 = arith.constant 0 : i32
    %c0_i32_1 = arith.constant 0 : i32
    return %arg0, %c0_i32, %c0_i32_0 : i32, i32, i32
  }
}

</mosaic_0001>

<bundles_post_ra>
// kernel: tpu_custom_call.1
= control target key start
LH: loop header
LB: loop body
LE: loop exit
PB: predicated region body
PF: predicated region fallthrough
CT: control target
= control target key end

     0   :  { %7 = vsyncpa [#allocation3], 0  ;;  %s1059_s0 = inlined_call_operand.hbm [shape: f32[2,4,290], index: 0, kind: input, shape index: {}]   ;;  %s1060_s1 = inlined_call_operand.hbm [shape: f32[8,36], index: 1, kind: input, shape index: {}]   ;;  %s1061_s2 = inlined_call_operand.vmem [shape: f32[2,12,256], index: 2, kind: output, shape index: {}]  }
   0x1   :  { %9 = vsyncpa [#allocation3 + $0x1], 0 }
   0x2   :  { %10 = vsyncpa [#allocation5], 0  ;;  %s814_s9 = smov 0   ;;  %s816_s10 = smov 0  }
   0x3   :  { %s818_s11 = smov 0   ;;  %s820_s12 = smov 0  }
   0x4 LB: > { %s833_s13 = sadd.s32 4294967295, %s785_s12   ;;  %p36_p0 = scmp.ne.s32.totalorder %s777_s10, %s773_s9  ;;  %s785_s12 = sphi %s820_s12, %s1079_s12   ;;  %s781_s11 = sphi %s818_s11, %s1078_s11   ;;  %s777_s10 = sphi %s816_s10, %s1077_s10   ;;  %s773_s9 = sphi %s814_s9, %s1076_s9  }
   0x5   : > { %p1062_p1 = scmp.eq.s32.totalorder %s833_s13, 0  ;;  %p566_p2 = scmp.ge.s32.totalorder %s785_s12, 1 }
   0x6   : > { %p94_p3 = scmp.lt.s32.totalorder %s785_s12, 3  ;;  %s787_s16 = smov [#allocation4]  }
   0x7   : > { %p841_p4 = por %p1062_p1, %p36_p0  ;;  %s107_s17 = sshll.u32 %s787_s16, 4  ;;  %s108_s17 = int_to_ptr.vmem [resolvable:$true] %s107_s17 }
   0x8   : > { %p845_p5 = pnand %p566_p2, %p94_p3  ;;  %s852_s18 = sadd.s32 1, %s785_s12  }
   0x9   : > { %s1065_s14 = scalar_select %p841_p4, 1, 0 }
   0xa   : > { %s1066_s15 = scalar_select %p845_p5, 1, 0 }
   0xb   : > { %p597_p6 = pneg %p845_p5  ;;  %s20_s20 = ssub.s32 %s785_s12, %s852_s18 }
   0xc   : > { %p862_p8 = scmp.eq.s32.totalorder %s20_s20, 0  ;;  %s23_s22 = sadd.s32 1, %s781_s11 }
   0xd   : > { %p856_p7 = pnand %p597_p6, %p1062_p1  ;;  %s689_s25 = scalar_lea.hbm %s1060_s1, 128 }
   0xe   : > { %s1068_s21 = scalar_select %p862_p8, 1, 0 }
   0xf   : > { %p690_p10 = scmp.ne.s32.totalorder %s1060_s1, %s689_s25  ;;  %p691_p11 = pneg %p856_p7 }
  0x10   : > { %p696_p0 = scmp.lt.u32.totalorder %s689_s25, %s1060_s1 }
  0x11   : > { %p692_p12 = pnand %p691_p11, %p690_p10 }
  0x13   : > { %p693_p13 = pneg %p692_p12 }
  0x15   : > { %p698_p2 = pnand %p696_p0, %p693_p13 }
  0x17   : > { %701 = shalt.err (!%p698_p2)
}
  0x18   : > { %s702_s30 = scalar_lea.vmem %s108_s17, 128  ;;  %p710_p9 = scmp.lt.s32.totalorder %s108_s17, %s108_s17 }
  0x19   : > { %p703_p3 = scmp.ne.s32.totalorder %s108_s17, %s702_s30  ;;  %p711_p4 = scmp.lt.s32.totalorder %s702_s30, %s702_s30 }
  0x1b   : > { %p705_p6 = pnand %p703_p3, %p691_p11  ;;  %p712_p5 = por %p711_p4, %p710_p9 }
  0x1d   : > { %p706_p1 = pneg %p705_p6 }
  0x1f   : > { %p713_p8 = pnand %p712_p5, %p706_p1 }
  0x21   : > { %716 = shalt.err (!%p713_p8)
}
  0x22   : > { %600 = dma.hbm_to_vmem [thread:$0]  (!%p856_p7), %s1060_s1, 128, %s108_s17, [#allocation5]  }
  0x23   : > { %p1069_p10 = scmp.ne.s32.totalorder %s1068_s21, 0  ;;  %p31_p4 = scmp.eq.s32.totalorder %s785_s12, 0 }
  0x24   : > { %p606_p1 = scmp.lt.s32.totalorder %s785_s12, 2  ;;  %s118_s6 = sand.u32 1, %s781_s11  }
  0x25   : > { %s888_s5 = scalar_select %p1069_p10, %s781_s11, %s23_s22  }
  0x26   : > { %s589_s7 = smul.u32 192, %s785_s12  ;;  %p1070_p5 = scmp.ne.s32.totalorder %s781_s11, %s777_s10 }
  0x27   : > { %s588_s8 = smul.u32 12, %s118_s6  ;;  %s119_s21 = scalar_lea.sflag [#allocation3], %s118_s6 }
  0x28   : > { %p32_p8 = por %p31_p4, %p1070_p5  ;;  %s904_s17 = scalar_lea.hbm %s1059_s0, %s589_s7 }
  0x29   : > { %s122_s20 = scalar_lea.vmem [#allocation2], %s588_s8  ;;  %s717_s22 = scalar_lea.hbm %s904_s17, 192 }
  0x2a   : > { %p897_p9 = pnand %p606_p1, %p32_p8  ;;  %s130_s12 = sshll.u32 %s122_s20, 4  ;;  %s906_s12 = int_to_ptr.vmem [resolvable:$true] %s130_s12 }
  0x2b   : > { %p718_p7 = scmp.ne.s32.totalorder %s904_s17, %s717_s22  ;;  %s722_s25 = scalar_lea.hbm %s1059_s0, 384 }
  0x2c   : > { %p719_p11 = pneg %p897_p9  ;;  %p723_p0 = scmp.lt.u32.totalorder %s904_s17, %s1059_s0 }
  0x2d   : > { %p724_p2 = scmp.lt.u32.totalorder %s722_s25, %s717_s22  ;;  %p726_p6 = scmp.lt.u32.totalorder %s717_s22, %s904_s17 }
  0x2e   : > { %p720_p12 = pnand %p719_p11, %p718_p7 }
  0x2f   : > { %p725_p3 = por %p724_p2, %p723_p0 }
  0x30   : > { %p721_p13 = pneg %p720_p12 }
  0x31   : > { %p727_p10 = por %p726_p6, %p725_p3 }
  0x33   : > { %p728_p4 = pnand %p727_p10, %p721_p13 }
  0x35   : > { %731 = shalt.err (!%p728_p4)
}
  0x36   : > { %s732_s28 = scalar_lea.vmem %s906_s12, 192  ;;  %s788_s29 = smov [#allocation2]  }
  0x37   : > { %p733_p1 = scmp.ne.s32.totalorder %s906_s12, %s732_s28  ;;  %s737_s30 = sshll.u32 %s788_s29, 4  ;;  %s738_s30 = int_to_ptr.vmem [resolvable:$false] %s737_s30 }
  0x38   : > { %s739_s3 = scalar_lea.vmem %s738_s30, 384  ;;  %p740_p7 = scmp.lt.s32.totalorder %s906_s12, %s738_s30 }
  0x39   : > { %p735_p5 = pnand %p733_p1, %p719_p11  ;;  %p741_p12 = scmp.lt.s32.totalorder %s739_s3, %s732_s28 }
  0x3b   : > { %p736_p8 = pneg %p735_p5  ;;  %p742_p0 = por %p741_p12, %p740_p7 }
  0x3d   : > { %p743_p2 = pnand %p742_p0, %p736_p8 }
  0x3f   : > { %746 = shalt.err (!%p743_p2)
}
  0x40   : > { %604 = dma.hbm_to_vmem [thread:$0]  (!%p897_p9), %s904_s17, 192, %s906_s12, %s119_s21  }
  0x41   : > { %p1072_p13 = scmp.ne.s32.totalorder %s1066_s15, 0 }
  0x42   : > { %s141_s4 = sand.u32 (!%p1072_p13), 1, %s777_s10   ;;  %p1073_p11 = scmp.ne.s32.totalorder (!%p1072_p13), %s1065_s14, 0 }
  0x43   : > { %139 = sbr.rel (%p1072_p13) target bundleno = 686 (0x2ae), region = 28  ;;  %s142_s7 = scalar_lea.sflag (!%p1072_p13), [#allocation3], %s141_s4 }
  0x44   : > { %s590_s6 = smul.u32 (!%p1072_p13), 12, %s141_s4 }
  0x46   : > { %s145_s8 = scalar_lea.vmem (!%p1072_p13), [#allocation2], %s590_s6 }
  0x4a   : > { %764 = dma.done.wait (%p1073_p11), %s142_s7, 192  }
  0x4b   : > { %766 = vsyncadd (%p1073_p11), %s142_s7, 4294967104  ;;  %p1074_p3 = scmp.eq.s32.totalorder %s833_s13, 0 }
  0x4d   : > { %768 = dma.done.wait (%p1074_p3), [#allocation5], 128   ;;  %p1075_p6 = pmov %p1074_p3 }
  0x4e   : > { %v944_v0 = vld [vmem:[%s145_s8] sm:$0xff]  ;;  %v222_v1 = vld [vmem:[%s145_s8 + $0x8] sm:$0xf]  ;;  %s789_s15 = smov 126   ;;  %s790_s9 = smov 112   ;;  %v796_v9 = vmov 0.0   ;;  %v177_v10 = vlaneseq }
  0x4f   : > { %770 = vsyncadd (%p1075_p6), [#allocation5], 4294967168  ;;  %236 = vrot.lane.b32.xlu1 %v944_v0, %s789_s15  ;;  %249 = vrot.lane.b32.xlu0 %v944_v0, %s790_s9  ;;  %v950_v2 = vcombine.high %v944_v0, %v944_v0  ;;  %v302_v3 = vcombine.low %v222_v1, %v222_v1  ;;  %s791_s14 = smov 110   ;;  %s792_s16 = smov 127   ;;  %v301_v6 = vcombine.low %v944_v0, %v944_v0  ;;  %v957_v7 = vld [vmem:[%s145_s8 + $0x8] sm:$0xf] }
  0x50   : > { %s793_s19 = smov 96   ;;  %s794_s17 = smov 95   ;;  %435 = vmatprep.mubr.f32.mxu0 %v796_v9  ;;  %v178_v11 = vand.u32 127, %v177_v10  ;;  %vm255_vm0 = vcmask 916480   ;;  %vm242_vm4 = vcmask 1031168   ;;  %vm309_vm5 = vcmask 1039360  }
  0x51   : > { %v656_v4 = vpack.i.bf16 %v222_v1, %v950_v2  ;;  %v661_v5 = vpack.i.bf16 %v302_v3, %v944_v0  ;;  %v676_v8 = vpack.i.bf16 %v957_v7, %v950_v2  ;;  %s795_s20 = smov 111   ;;  %s797_s12 = smov 94   ;;  %vm351_vm6 = vcmask 1043456  }
  0x52   : > { %v179_v12 = vadd.s32 128, %v178_v11  ;;  %v184_v13 = vand.u32 15, %v178_v11  ;;  %vm268_vm8 = vcmask 900096   ;;  %vm281_vm9 = vcmask 785408   ;;  %s798_s21 = smov 17   ;;  %p170_p9 = scmp.lt.s32.totalorder %s833_s13, 1 }
  0x53   : > { %657 = vrot.lane.b32.xlu1 %v656_v4, %s789_s15  ;;  %652 = vrot.lane.b32.xlu0 %v656_v4, %s790_s9  ;;  %vm329_vm10 = vcmask 908288   ;;  %vm346_vm11 = vcmask 777216   ;;  %vm294_vm12 = vcmask 769024   ;;  %vm361_vm13 = vcmask 293888  }
  0x54   : > { %v191_v14 = vand.u32 15, %v179_v12  ;;  %v969_v18 = vadd.s32 4294967295, %v184_v13  ;;  %v975_v26 = vadd.s32 1, %v184_v13  ;;  %vm453_vm14 = vcmask 138240   ;;  %s1081_s13 = smov (!%p170_p9, %s833_s13), 1 }
  0x55   : > { %s579_s22 = sshll.u32 %s1081_s13, 5 }
  0x56   : > { %v967_v17 = vadd.s32 4294967295, %v191_v14  ;;  %v971_v19 = vadd.s32 1, %v191_v14  ;;  %vm207_vm2 = vcmp.ge.s32.totalorder %v969_v18, 0  ;;  %vm227_vm7 = vcmp.lt.s32.totalorder %v975_v26, 16  ;;  %s174_s25 = scalar_lea.vmem %s1061_s2, %s579_s22 }
  0x57   : > { %667 = vrot.lane.b32.xlu1 %v656_v4, %s791_s14  ;;  %662 = vrot.lane.b32.xlu0 %v661_v5, %s792_s16  ;;  %v220_v42 = vsel %vm207_vm2, %v944_v0, 0.0 }
  0x58   : > { %vm208_vm1 = vcmp.ge.s32.totalorder %v967_v17, 0  ;;  %vm228_vm3 = vcmp.lt.s32.totalorder %v971_v19, 16 }
  0x59   : > { %v221_v36 = vsel %vm208_vm1, %v950_v2, 0.0 }
  0x5b   : > { %262 = vrot.lane.b32.xlu1 %v944_v0, %s791_s14  ;;  %303 = vrot.lane.b32.xlu0 %v301_v6, %s792_s16 }
  0x5f   : > { %275 = vrot.lane.b32.xlu1 %v944_v0, %s793_s19  ;;  %672 = vrot.lane.b32.xlu0 %v656_v4, %s793_s19 }
  0x63   : > { %682 = vrot.lane.b32.xlu1 %v661_v5, %s794_s17  ;;  %677 = vrot.lane.b32.xlu0 %v676_v8, %s795_s20 }
  0x67   : > { %340 = vrot.lane.b32.xlu1 %v301_v6, %s794_s17  ;;  %323 = vrot.lane.b32.xlu0 %v944_v0, %s795_s20 }
  0x6b   : > { %292 = vrot.lane.b32.xlu1 %v222_v1, %s797_s12  ;;  %290 = vrot.lane.b32.xlu0 %v950_v2, %s797_s12 }
  0x6f   : > { %288 = vrot.lane.b32.xlu0 %v944_v0, %s797_s12 }
  0xc1   : > { %v237_v15 = vpop.permute.xlu1 %236  ;;  %v250_v16 = vpop.permute.xlu0 %249 }
  0xc5   : > { %v658_v20 = vpop.permute.xlu1 %657  ;;  %v653_v21 = vpop.permute.xlu0 %652 }
  0xc6   : > { %v660_v22 = vunpack.i.h.bf16 %v658_v20  ;;  %v659_v23 = vunpack.i.l.bf16 %v658_v20  ;;  %v655_v24 = vunpack.i.h.bf16 %v653_v21  ;;  %v654_v25 = vunpack.i.l.bf16 %v653_v21 }
  0xc8   : > { %v256_v27 = vsel %vm255_vm0, %v250_v16, %v654_v25  ;;  %v257_v28 = vsel %vm255_vm0, %v654_v25, %v655_v24  ;;  %v244_v29 = vsel %vm242_vm4, %v659_v23, %v660_v22  ;;  %v243_v39 = vsel %vm242_vm4, %v237_v15, %v659_v23 }
  0xc9   : > { %v668_v30 = vpop.permute.xlu1 %667  ;;  %v663_v31 = vpop.permute.xlu0 %662  ;;  %v261_v32 = vsel %vm208_vm1, %v257_v28, 0.0  ;;  %v260_v33 = vsel %vm207_vm2, %v256_v27, 0.0  ;;  %v248_v37 = vsel %vm228_vm3, %v244_v29, 0.0  ;;  %v247_v51 = vsel %vm227_vm7, %v243_v39, 0.0 }
  0xca   : > { %v665_v34 = vunpack.i.h.bf16 %v663_v31  ;;  %v664_v35 = vunpack.i.l.bf16 %v663_v31  ;;  %v317_v38 = vrot.slane %v261_v32, 4  ;;  %v316_v40 = vrot.slane %v260_v33, 4 }
  0xcb   : > { %v670_v43 = vunpack.i.h.bf16 %v668_v30  ;;  %v669_v44 = vunpack.i.l.bf16 %v668_v30 }
  0xcc   : > { %v311_v41 = vsel %vm309_vm5, %v664_v35, %v665_v34  ;;  %v355_v48 = vsel %vm351_vm6, %v248_v37, %v317_v38  ;;  %v354_v53 = vsel %vm351_vm6, %v247_v51, %v316_v40  ;;  %v360_v34 = vld [vmem:[#allocation4] sm:$0xff] }
  0xcd   : > { %v263_v45 = vpop.permute.xlu1 %262  ;;  %v304_v46 = vpop.permute.xlu0 %303  ;;  %v353_v47 = vsel %vm351_vm6, %v221_v36, %v311_v41  ;;  %v270_v55 = vsel %vm268_vm8, %v669_v44, %v670_v43 }
  0xce   : > { %v310_v49 = vsel %vm309_vm5, %v304_v46, %v664_v35  ;;  %v580_v50 = vpack.c.bf16 %v355_v48, %v353_v47  ;;  %v269_v58 = vsel %vm268_vm8, %v263_v45, %v669_v44  ;;  %v274_v61 = vsel %vm228_vm3, %v270_v55, 0.0 }
  0xcf   : > { %v352_v52 = vsel %vm351_vm6, %v220_v42, %v310_v49  ;;  %v273_v62 = vsel %vm227_vm7, %v269_v58, 0.0  ;;  %v337_v9 = vrot.slane %v274_v61, 4 }
  0xd0   : > { %581 = vmatprep.subr.bf16.mxu0 %v580_v50  ;;  %v582_v54 = vpack.c.bf16 %v354_v53, %v352_v52  ;;  %v336_v14 = vrot.slane %v273_v62, 4 }
  0xd1   : > { %v276_v56 = vpop.permute.xlu1 %275  ;;  %v673_v57 = vpop.permute.xlu0 %672 }
  0xd2   : > { %v675_v59 = vunpack.i.h.bf16 %v673_v57  ;;  %v674_v60 = vunpack.i.l.bf16 %v673_v57  ;;  %583 = vmatpush1.bf16.msra.mxu0 %v582_v54 }
  0xd4   : > { %v283_v63 = vsel %vm281_vm9, %v674_v60, %v675_v59  ;;  %v282_v10 = vsel %vm281_vm9, %v276_v56, %v674_v60 }
  0xd5   : > { %v683_v1 = vpop.permute.xlu1 %682  ;;  %v678_v3 = vpop.permute.xlu0 %677  ;;  %v287_v13 = vsel %vm208_vm1, %v283_v63, 0.0  ;;  %v286_v22 = vsel %vm207_vm2, %v282_v10, 0.0 }
  0xd6   : > { %v685_v4 = vunpack.i.h.bf16 %v683_v1  ;;  %v684_v5 = vunpack.i.l.bf16 %v683_v1  ;;  %v680_v6 = vunpack.i.h.bf16 %v678_v3  ;;  %v679_v8 = vunpack.i.l.bf16 %v678_v3 }
  0xd8   : > { %v331_v11 = vsel %vm329_vm10, %v679_v8, %v680_v6  ;;  %v348_v12 = vsel %vm346_vm11, %v684_v5, %v685_v4 }
  0xd9   : > { %v341_v15 = vpop.permute.xlu1 %340  ;;  %v324_v16 = vpop.permute.xlu0 %323  ;;  %v357_v20 = vsel %vm351_vm6, %v331_v11, %v337_v9  ;;  %v359_v21 = vsel %vm351_vm6, %v287_v13, %v348_v12 }
  0xda   : > { %v347_v23 = vsel %vm346_vm11, %v341_v15, %v684_v5  ;;  %v330_v24 = vsel %vm329_vm10, %v324_v16, %v679_v8  ;;  %v584_v25 = vpack.c.bf16 %v359_v21, %v357_v20 }
  0xdb   : > { %v358_v27 = vsel %vm351_vm6, %v286_v22, %v347_v23  ;;  %v356_v17 = vsel %vm351_vm6, %v330_v24, %v336_v14 }
  0xdc   : > { %585 = vmatprep.subr.bf16.mxu0 %v584_v25  ;;  %v586_v28 = vpack.c.bf16 %v358_v27, %v356_v17 }
  0xdd   : > { %v293_v29 = vpop.permute.xlu1 %292  ;;  %v291_v30 = vpop.permute.xlu0 %290 }
  0xde   : > { %v296_v31 = vsel %vm294_vm12, %v291_v30, %v293_v29  ;;  %587 = vmatpush1.bf16.msra.mxu0 %v586_v28 }
  0xdf   : > { %v300_v18 = vsel %vm228_vm3, %v296_v31, 0.0 }
  0xe0   : > { %574 = vmatprep.subr.msk.mxu0 %vm351_vm6, %v300_v18 }
  0xe1   : > { %v289_v32 = vpop.permute.xlu0 %288 }
  0xe2   : > { %v295_v33 = vsel %vm294_vm12, %v289_v32, %v291_v30 }
  0xe3   : > { %v299_v35 = vsel %vm227_vm7, %v295_v33, 0.0 }
  0xe4   : > { %575 = vmatpush1.msk.msra.mxu0 %vm351_vm6, %v299_v35 }
  0xe5   : > { %576 = vmatmul.mubr.msk.f32.vlgmr.msra.gmra.mrb[0].mxu0 %vm361_vm13, %v360_v34 }
 0x1b8   : > { %v437_v36 = vpop.f32.mrb[0].mxu0 }
 0x1b9   : > { %v442_v37 = vmax.f32 %v437_v36, 0.0  ;;  %v439_v38 = vpop.f32.mrb[1].mxu0 }
 0x1ba   : > { %v443_v39 = vmax.f32 %v439_v38, 0.0 }
 0x1bb   : > { %v447_v40 = vrot.slane %v442_v37, 4 }
 0x1bc   : > { %v448_v41 = vrot.slane %v443_v39, 4 }
 0x1bd   : > { %449 = vrot.lane.b32.xlu1 %v447_v40, %s798_s21 }
 0x1be   : > { %451 = vrot.lane.b32.xlu0 %v448_v41, %s798_s21 }
 0x22f   : > { %v450_v19 = vpop.permute.xlu1 %449 }
 0x230   : > { %470 = vrot.lane.b32.xlu0 %v450_v19, %s795_s20  ;;  %v452_v26 = vpop.permute.xlu0 %451  ;;  %v458_v42 = vsel %vm351_vm6, %v944_v0, %v450_v19 }
 0x231   : > { %v454_v43 = vsel %vm453_vm14, %v450_v19, %v452_v26  ;;  %464 = vrot.lane.b32.xlu1 %v458_v42, %s795_s20  ;;  %v460_v45 = vsel %vm351_vm6, %v957_v7, %v452_v26 }
 0x232   : > { %v459_v44 = vsel %vm351_vm6, %v950_v2, %v454_v43 }
 0x234   : > { %466 = vrot.lane.b32.xlu0 %v459_v44, %s795_s20 }
 0x235   : > { %468 = vrot.lane.b32.xlu1 %v460_v45, %s795_s20 }
 0x238   : > { %474 = vrot.lane.b32.xlu0 %v452_v26, %s795_s20 }
 0x239   : > { %472 = vrot.lane.b32.xlu1 %v454_v43, %s795_s20 }
 0x2a2   : > { %v471_v0 = vpop.permute.xlu0 %470 }
 0x2a3   : > { %v465_v46 = vpop.permute.xlu1 %464 }
 0x2a6   : > { %v467_v2 = vpop.permute.xlu0 %466 }
 0x2a7   : > { %v476_v47 = vsel %vm329_vm10, %v465_v46, %v467_v2  ;;  %v469_v48 = vpop.permute.xlu1 %468 }
 0x2a8   : > { %484 = vst [vmem:[%s174_s25] sm:$0xff] %v476_v47  ;;  %v477_v7 = vsel %vm329_vm10, %v467_v2, %v469_v48 }
 0x2a9   : > { %485 = vst [vmem:[%s174_s25 + $0x8] sm:$0xff] %v477_v7 }
 0x2aa   : > { %v475_v49 = vpop.permute.xlu0 %474 }
 0x2ab   : > { %v473_v50 = vpop.permute.xlu1 %472 }
 0x2ac   : > { %v478_v51 = vsel %vm329_vm10, %v471_v0, %v473_v50  ;;  %v479_v52 = vsel %vm329_vm10, %v473_v50, %v475_v49 }
 0x2ad   : > { %486 = vst [vmem:[%s174_s25 + $0x10] sm:$0xf] %v478_v51  ;;  %487 = vst [vmem:[%s174_s25 + $0x18] sm:$0xf] %v479_v52 }
 0x2ae PF: > { %p13_p10 = scmp.ge.s32.totalorder %s852_s18, 4   ;;  %s1076_s9 = smov %s777_s10 }
 0x2af   : > { %s1077_s10 = smov %s781_s11  ;;  %s1078_s11 = smov %s888_s5 }
 0x2b0   : > { %s1079_s12 = smov %s852_s18  ;;  %15 = sbr.rel (!%p13_p10) target bundleno = 4 (0x4), region = 72 }
 0x2b7   :  { %509 = vsyncpa [#allocation3], 1 }
 0x2b8   :  { %511 = vsyncpa [#allocation3 + $0x1], 1 }
 0x2b9   :  { %512 = vsyncpa [#allocation5], 1 }

</bundles_post_ra>
